<compile_context>
chip_gen: v7x
topology: tpu7x:2x2x1
jax: 0.10.0
libtpu: 0.0.40
codegen_flags: <defaults>
</compile_context>

<pallas_src>
import jax
import jax.numpy as jnp
from jax.experimental import pallas as pl
from jax.experimental.pallas import tpu as pltpu

_DOUT_LANES = 128  # lane-dense width for the discriminator-probability output


# ----------------------------------------------------------------------------
# Fused Pallas kernel: x_fake = G(z); d = D([x_fake ; x_real])
# ----------------------------------------------------------------------------
def _mmgan_fused_kernel(z_ref, x_real_ref,
                        gw1_ref, gb1_ref, gw2_ref, gb2_ref,
                        dw1_ref, db1_ref, dw2_ref, db2_ref,
                        x_fake_ref, d_out_ref,
                        x_all_ref):
    f32 = jnp.float32
    B = z_ref.shape[0]

    # ---- Generator ----------------------------------------------------------
    # (B, Z) @ (Z, H): bf16 operands, f32 accumulation on the MXU.
    h = jnp.dot(z_ref[...].astype(gw1_ref.dtype), gw1_ref[...],
                preferred_element_type=f32)
    h = h + gb1_ref[...]
    h = jnp.where(h > 0, h, 0.2 * h)                       # LeakyReLU(0.2)

    # (B, H) @ (H, d_img)
    x = jnp.dot(h.astype(gw2_ref.dtype), gw2_ref[...],
                preferred_element_type=f32)
    x_fake = jnp.tanh(x + gb2_ref[...])                    # (B, d_img), f32
    x_fake_ref[...] = x_fake.astype(x_fake_ref.dtype)

    # ---- Discriminator on [fake ; real] -------------------------------------
    # Stack in VMEM scratch: keeps x_fake on-chip and doubles effective M.
    x_all_ref[:B, :] = x_fake
    x_all_ref[B:, :] = x_real_ref[...].astype(f32)

    hd = jnp.dot(x_all_ref[...].astype(dw1_ref.dtype), dw1_ref[...],
                 preferred_element_type=f32)               # (2B, H)
    hd = hd + db1_ref[...]
    hd = jnp.where(hd > 0, hd, 0.2 * hd)                   # LeakyReLU(0.2)

    # Output layer (H -> 1): an N=1 MXU matmul wastes 127/128+ of the array,
    # so do it as a VPU multiply + XLU reduce instead.
    logit = jnp.sum(hd * dw2_ref[...], axis=-1, keepdims=True) + db2_ref[...]
    prob = jax.nn.sigmoid(logit)                           # (2B, 1)
    # Lane-dense (width 128) unmasked store; wrapper slices column 0.
    d_out_ref[...] = jnp.broadcast_to(prob, d_out_ref.shape)


def mmgan_forward(z, x_real_flat, g_params, d_params):
    """Fused forward: returns (x_fake_flat (B, d_img), d_fake (B,1), d_real (B,1))."""
    gw1, gb1, gw2, gb2 = g_params
    dw1, db1, dw2_row, db2 = d_params
    B, z_dim = z.shape
    hidden = gw1.shape[1]
    d_img = gw2.shape[1]

    def vmem():
        return pl.BlockSpec(memory_space=pltpu.VMEM)

    # Advisory cost estimate so XLA can overlap this small custom call.
    flops = 2 * (B * z_dim * hidden          # G layer 1
                 + B * hidden * d_img        # G layer 2
                 + 2 * B * d_img * hidden    # D layer 1 on [fake; real]
                 + 2 * B * hidden)           # D output reduce
    transcendentals = B * d_img + 2 * B      # tanh + sigmoid
    bytes_accessed = (z.nbytes + x_real_flat.nbytes
                      + sum(int(p.nbytes) for p in g_params)
                      + sum(int(p.nbytes) for p in d_params)
                      + B * d_img * 4 + 2 * B * _DOUT_LANES * 4)

    x_fake_flat, d_out = pl.pallas_call(
        _mmgan_fused_kernel,
        out_shape=(
            jax.ShapeDtypeStruct((B, d_img), jnp.float32),
            jax.ShapeDtypeStruct((2 * B, _DOUT_LANES), jnp.float32),
        ),
        in_specs=[vmem()] * 10,
        out_specs=(vmem(), vmem()),
        scratch_shapes=[pltpu.VMEM((2 * B, d_img), jnp.float32)],
        cost_estimate=pl.CostEstimate(
            flops=flops,
            transcendentals=transcendentals,
            bytes_accessed=bytes_accessed),
        compiler_params=pltpu.CompilerParams(
            vmem_limit_bytes=32 * 1024 * 1024),
    )(z, x_real_flat, gw1, gb1, gw2, gb2, dw1, db1, dw2_row, db2)

    d_fake = d_out[:B, :1]
    d_real = d_out[B:, :1]
    return x_fake_flat, d_fake, d_real


# ----------------------------------------------------------------------------
# MMGAN wrapper (plain-JAX glue around the fused Pallas kernel)
# ----------------------------------------------------------------------------
class MMGANPallas:
    def __init__(self, image_shape, z_dim, hidden=128, output_dim=1, seed=0):
        assert output_dim == 1, "MM-GAN discriminator emits a single P(generated)"
        self.image_shape = image_shape
        self.z_dim = z_dim
        self.output_dim = output_dim
        c, h, w = image_shape
        d_img = c * h * w

        key = jax.random.PRNGKey(seed)
        ks = jax.random.split(key, 4)
        scale = 0.02

        # Generator params: matmul weights in bf16, biases in f32.
        self.g_params = (
            (scale * jax.random.normal(ks[0], (z_dim, hidden))).astype(jnp.bfloat16),
            jnp.zeros((1, hidden), jnp.float32),
            (scale * jax.random.normal(ks[1], (hidden, d_img))).astype(jnp.bfloat16),
            jnp.zeros((1, d_img), jnp.float32),
        )
        # Discriminator params: big weight in bf16; output row + biases in f32
        # (output layer runs on the VPU, not the MXU).
        self.d_params = (
            (scale * jax.random.normal(ks[2], (d_img, hidden))).astype(jnp.bfloat16),
            jnp.zeros((1, hidden), jnp.float32),
            (scale * jax.random.normal(ks[3], (1, hidden))).astype(jnp.float32),
            jnp.zeros((1, 1), jnp.float32),
        )

    def __call__(self, z, x_real_nchw):
        c, h, w = self.image_shape
        b = z.shape[0]
        x_real_flat = x_real_nchw.reshape(b, -1)  # NCHW row-major flatten (torch order)
        x_fake_flat, d_fake, d_real = mmgan_forward(
            z, x_real_flat, self.g_params, self.d_params)
        x_fake = x_fake_flat.reshape(b, c, h, w)  # back to NCHW
        return x_fake, d_fake, d_real


if __name__ == "__main__":
    # Small, module-consistent shapes.
    batch = 8
    image_shape = (4, 16, 16)   # (C, H, W) -> d_img = 1024
    z_dim = 32

    key = jax.random.PRNGKey(0)
    kz, kx = jax.random.split(key)
    z = jax.random.normal(kz, (batch, z_dim), dtype=jnp.float32)
    x_real = jax.random.normal(kx, (batch,) + image_shape, dtype=jnp.float32)

    gan = MMGANPallas(image_shape, z_dim, hidden=128, output_dim=1, seed=0)

    x_fake, d_fake, d_real = gan(z, x_real)
    jax.block_until_ready((x_fake, d_fake, d_real))

    assert x_fake.shape == (batch,) + image_shape
    assert d_fake.shape == (batch, 1)
    assert d_real.shape == (batch, 1)
    # tanh output range
    assert bool(jnp.all(jnp.abs(x_fake) <= 1.0))
    # sigmoid outputs must lie in (0, 1)
    assert bool(jnp.all((d_fake > 0) & (d_fake < 1)))
    assert bool(jnp.all((d_real > 0) & (d_real < 1)))

    print("KERNEL_OK")
</pallas_src>

<mosaic_0001>
module attributes {stable_mosaic.version = 11 : i64} {
  func.func @_mmgan_fused_kernel(%arg0: memref<8x32xf32, #tpu.memory_space<vmem>>, %arg1: memref<8x1024xf32, #tpu.memory_space<vmem>>, %arg2: memref<32x128xbf16, #tpu.memory_space<vmem>>, %arg3: memref<1x128xf32, #tpu.memory_space<vmem>>, %arg4: memref<128x1024xbf16, #tpu.memory_space<vmem>>, %arg5: memref<1x1024xf32, #tpu.memory_space<vmem>>, %arg6: memref<1024x128xbf16, #tpu.memory_space<vmem>>, %arg7: memref<1x128xf32, #tpu.memory_space<vmem>>, %arg8: memref<1x128xf32, #tpu.memory_space<vmem>>, %arg9: memref<1x1xf32, #tpu.memory_space<vmem>>, %arg10: memref<8x1024xf32, #tpu.memory_space<vmem>>, %arg11: memref<16x128xf32, #tpu.memory_space<vmem>>, %arg12: memref<16x1024xf32, #tpu.memory_space<vmem>>) attributes {dimension_semantics = [], scalar_prefetch = 0 : i64, scratch_operands = 1 : i64, tpu.core_type = #tpu.core_type<tc>} {
    %c0 = arith.constant 0 : index
    %c0_0 = arith.constant 0 : index
    %0 = vector.load %arg0[%c0, %c0_0] : memref<8x32xf32, #tpu.memory_space<vmem>>, vector<8x32xf32>
    %1 = arith.truncf %0 : vector<8x32xf32> to vector<8x32xbf16>
    %c0_1 = arith.constant 0 : index
    %c0_2 = arith.constant 0 : index
    %2 = vector.load %arg2[%c0_1, %c0_2] : memref<32x128xbf16, #tpu.memory_space<vmem>>, vector<32x128xbf16>
    %cst = arith.constant dense<0.000000e+00> : vector<8x128xf32>
    %3 = tpu.matmul %1, %2, %cst {dimension_numbers = #tpu.dot_dimension_numbers<[1], [0], [0], [1], [0, 0, 1, 1], [], []>} : vector<8x32xbf16>, vector<32x128xbf16>, vector<8x128xf32> -> vector<8x128xf32>
    %c0_3 = arith.constant 0 : index
    %c0_4 = arith.constant 0 : index
    %4 = vector.load %arg3[%c0_3, %c0_4] : memref<1x128xf32, #tpu.memory_space<vmem>>, vector<1x128xf32>
    %5 = vector.broadcast %4 : vector<1x128xf32> to vector<8x128xf32>
    %6 = arith.addf %3, %5 : vector<8x128xf32>
    %cst_5 = arith.constant 0.000000e+00 : f32
    %7 = vector.broadcast %cst_5 : f32 to vector<8x128xf32>
    %8 = arith.cmpf ogt, %6, %7 : vector<8x128xf32>
    %cst_6 = arith.constant 2.000000e-01 : f32
    %9 = vector.broadcast %cst_6 : f32 to vector<8x128xf32>
    %10 = arith.mulf %9, %6 : vector<8x128xf32>
    %11 = arith.select %8, %6, %10 : vector<8x128xi1>, vector<8x128xf32>
    %12 = arith.truncf %11 : vector<8x128xf32> to vector<8x128xbf16>
    %c0_7 = arith.constant 0 : index
    %c0_8 = arith.constant 0 : index
    %13 = vector.load %arg4[%c0_7, %c0_8] : memref<128x1024xbf16, #tpu.memory_space<vmem>>, vector<128x1024xbf16>
    %cst_9 = arith.constant dense<0.000000e+00> : vector<8x1024xf32>
    %14 = tpu.matmul %12, %13, %cst_9 {dimension_numbers = #tpu.dot_dimension_numbers<[1], [0], [0], [1], [0, 0, 1, 1], [], []>} : vector<8x128xbf16>, vector<128x1024xbf16>, vector<8x1024xf32> -> vector<8x1024xf32>
    %c0_10 = arith.constant 0 : index
    %c0_11 = arith.constant 0 : index
    %15 = vector.load %arg5[%c0_10, %c0_11] : memref<1x1024xf32, #tpu.memory_space<vmem>>, vector<1x1024xf32>
    %16 = vector.broadcast %15 : vector<1x1024xf32> to vector<8x1024xf32>
    %17 = arith.addf %14, %16 : vector<8x1024xf32>
    %18 = math.tanh %17 : vector<8x1024xf32>
    %c0_12 = arith.constant 0 : index
    %c0_13 = arith.constant 0 : index
    %19 = vector.load %arg10[%c0_12, %c0_13] : memref<8x1024xf32, #tpu.memory_space<vmem>>, vector<8x1024xf32>
    tpu.vector_store %arg10[%c0_12, %c0_13], %18 {strides = array<i32>} : memref<8x1024xf32, #tpu.memory_space<vmem>>, vector<8x1024xf32>,
    %c0_14 = arith.constant 0 : index
    %c0_15 = arith.constant 0 : index
    %20 = vector.load %arg12[%c0_14, %c0_15] : memref<16x1024xf32, #tpu.memory_space<vmem>>, vector<8x1024xf32>
    tpu.vector_store %arg12[%c0_14, %c0_15], %18 {strides = array<i32>} : memref<16x1024xf32, #tpu.memory_space<vmem>>, vector<8x1024xf32>,
    %c0_16 = arith.constant 0 : index
    %c0_17 = arith.constant 0 : index
    %21 = vector.load %arg1[%c0_16, %c0_17] : memref<8x1024xf32, #tpu.memory_space<vmem>>, vector<8x1024xf32>
    %c8 = arith.constant 8 : index
    %c0_18 = arith.constant 0 : index
    %22 = vector.load %arg12[%c8, %c0_18] : memref<16x1024xf32, #tpu.memory_space<vmem>>, vector<8x1024xf32>
    tpu.vector_store %arg12[%c8, %c0_18], %21 {strides = array<i32>} : memref<16x1024xf32, #tpu.memory_space<vmem>>, vector<8x1024xf32>,
    %c0_19 = arith.constant 0 : index
    %c0_20 = arith.constant 0 : index
    %23 = vector.load %arg12[%c0_19, %c0_20] : memref<16x1024xf32, #tpu.memory_space<vmem>>, vector<16x1024xf32>
    %24 = arith.truncf %23 : vector<16x1024xf32> to vector<16x1024xbf16>
    %c0_21 = arith.constant 0 : index
    %c0_22 = arith.constant 0 : index
    %25 = vector.load %arg6[%c0_21, %c0_22] : memref<1024x128xbf16, #tpu.memory_space<vmem>>, vector<1024x128xbf16>
    %cst_23 = arith.constant dense<0.000000e+00> : vector<16x128xf32>
    %26 = tpu.matmul %24, %25, %cst_23 {dimension_numbers = #tpu.dot_dimension_numbers<[1], [0], [0], [1], [0, 0, 1, 1], [], []>} : vector<16x1024xbf16>, vector<1024x128xbf16>, vector<16x128xf32> -> vector<16x128xf32>
    %c0_24 = arith.constant 0 : index
    %c0_25 = arith.constant 0 : index
    %27 = vector.load %arg7[%c0_24, %c0_25] : memref<1x128xf32, #tpu.memory_space<vmem>>, vector<1x128xf32>
    %28 = vector.broadcast %27 : vector<1x128xf32> to vector<16x128xf32>
    %29 = arith.addf %26, %28 : vector<16x128xf32>
    %cst_26 = arith.constant 0.000000e+00 : f32
    %30 = vector.broadcast %cst_26 : f32 to vector<16x128xf32>
    %31 = arith.cmpf ogt, %29, %30 : vector<16x128xf32>
    %cst_27 = arith.constant 2.000000e-01 : f32
    %32 = vector.broadcast %cst_27 : f32 to vector<16x128xf32>
    %33 = arith.mulf %32, %29 : vector<16x128xf32>
    %34 = arith.select %31, %29, %33 : vector<16x128xi1>, vector<16x128xf32>
    %c0_28 = arith.constant 0 : index
    %c0_29 = arith.constant 0 : index
    %35 = vector.load %arg8[%c0_28, %c0_29] : memref<1x128xf32, #tpu.memory_space<vmem>>, vector<1x128xf32>
    %36 = vector.broadcast %35 : vector<1x128xf32> to vector<16x128xf32>
    %37 = arith.mulf %34, %36 : vector<16x128xf32>
    %cst_30 = arith.constant dense<0.000000e+00> : vector<16xf32>
    %38 = vector.multi_reduction <add>, %37, %cst_30 [1] : vector<16x128xf32> to vector<16xf32>
    %39 = vector.shape_cast %38 : vector<16xf32> to vector<16x1xf32>
    %c0_31 = arith.constant 0 : index
    %c0_32 = arith.constant 0 : index
    %40 = vector.load %arg9[%c0_31, %c0_32] : memref<1x1xf32, #tpu.memory_space<vmem>>, vector<1x1xf32>
    %41 = vector.broadcast %40 : vector<1x1xf32> to vector<16x1xf32>
    %42 = arith.addf %39, %41 : vector<16x1xf32>
    %43 = arith.negf %42 : vector<16x1xf32>
    %44 = math.exp %43 : vector<16x1xf32>
    %cst_33 = arith.constant 1.000000e+00 : f32
    %45 = vector.broadcast %cst_33 : f32 to vector<16x1xf32>
    %46 = arith.addf %45, %44 : vector<16x1xf32>
    %47 = arith.divf %45, %46 : vector<16x1xf32>
    %48 = vector.shape_cast %47 : vector<16x1xf32> to vector<16x1xf32>
    %49 = vector.broadcast %48 : vector<16x1xf32> to vector<16x128xf32>
    %c0_34 = arith.constant 0 : index
    %c0_35 = arith.constant 0 : index
    %50 = vector.load %arg11[%c0_34, %c0_35] : memref<16x128xf32, #tpu.memory_space<vmem>>, vector<16x128xf32>
    tpu.vector_store %arg11[%c0_34, %c0_35], %49 {strides = array<i32>} : memref<16x128xf32, #tpu.memory_space<vmem>>, vector<16x128xf32>,
    return
  }
}

</mosaic_0001>

<bundles_post_ra>
// kernel: tpu_custom_call.1
= control target key start
LH: loop header
LB: loop body
LE: loop exit
PB: predicated region body
PF: predicated region fallthrough
CT: control target
= control target key end

     0   :  { %s2324_s0 = inlined_call_operand.hbm [shape: f32[8,32], index: 0, kind: input, shape index: {}]   ;;  %s2325_s1 = inlined_call_operand.hbm [shape: f32[8,1024], index: 1, kind: input, shape index: {}]   ;;  %s2326_s2 = inlined_call_operand.hbm [shape: bf16[32,128], index: 2, kind: input, shape index: {}]   ;;  %s2327_s3 = inlined_call_operand.vmem [shape: f32[1,128], index: 3, kind: input, shape index: {}]   ;;  %s2328_s4 = inlined_call_operand.hbm [shape: bf16[128,1024], index: 4, kind: input, shape index: {}]   ;;  %s2329_s5 = inlined_call_operand.vmem [shape: f32[1,1024], index: 5, kind: input, shape index: {}]   ;;  %s2330_s6 = inlined_call_operand.hbm [shape: bf16[1024,128], index: 6, kind: input, shape index: {}]   ;;  %s2331_s7 = inlined_call_operand.vmem [shape: f32[1,128], index: 7, kind: input, shape index: {}]   ;;  %s2332_s8 = inlined_call_operand.vmem [shape: f32[1,128], index: 8, kind: input, shape index: {}]   ;;  %s2333_s9 = inlined_call_operand.<no memory space> [shape: f32[1,1], index: 9, kind: input, shape index: {}]   ;;  %s2334_s10 = inlined_call_operand.hbm [shape: f32[8,1024], index: 10, kind: output, shape index: {0}]   ;;  %s2335_s11 = inlined_call_operand.hbm [shape: f32[16,128], index: 11, kind: output, shape index: {1}]  }
   0x1   :  { %v17_v0 = vstv %s2333_s9 }
   0x2   :  { %18 = vst [vmem:[#allocation3] sm:$0x1] %v17_v0 }
   0x3   :  { %19 = vsyncpa [#allocation5], 0 }
   0x4   :  { %20 = vsyncpa [#allocation8], 0 }
   0x5   :  { %21 = vsyncpa [#allocation11], 0 }
   0x6   :  { %22 = vsyncpa [#allocation6], 0 }
   0x7   :  { %23 = vsyncpa [#allocation15], 0  ;;  %s2109_s19 = smov [#allocation7]   ;;  %s2110_s21 = smov [#allocation10]  }
   0x8   :  { %s40_s20 = sshll.u32 %s2109_s19, 4  ;;  %s63_s22 = sshll.u32 %s2110_s21, 4  ;;  %s41_s20 = int_to_ptr.vmem [resolvable:$true] %s40_s20  ;;  %s2188_s22 = int_to_ptr.vmem [resolvable:$true] %s63_s22 }
   0x9   :  { %s1945_s25 = scalar_lea.hbm %s2325_s1, 1024 }
   0xa   :  { %p1946_p0 = scmp.ne.s32.totalorder %s2325_s1, %s1945_s25  ;;  %p1949_p1 = scmp.lt.u32.totalorder %s1945_s25, %s2325_s1 }
   0xc   :  { %p1951_p2 = pnand %p1949_p1, %p1946_p0 }
   0xe   :  { %1954 = shalt.err (!%p1951_p2)
}
   0xf   :  { %s1955_s29 = scalar_lea.vmem %s41_s20, 1024  ;;  %p1960_p4 = scmp.lt.s32.totalorder %s41_s20, %s41_s20 }
  0x10   :  { %p1956_p3 = scmp.ne.s32.totalorder %s41_s20, %s1955_s29  ;;  %p1961_p5 = scmp.lt.s32.totalorder %s1955_s29, %s1955_s29 }
  0x12   :  { %p1962_p6 = por %p1961_p5, %p1960_p4 }
  0x14   :  { %p1963_p7 = pnand %p1962_p6, %p1956_p3 }
  0x16   :  { %1966 = shalt.err (!%p1963_p7)
}
  0x17   :  { %43 = dma.hbm_to_vmem [thread:$0]  %s2325_s1, 1024, %s41_s20, [#allocation8]  }
  0x18   :  { %s1967_s15 = scalar_lea.hbm %s2328_s4, 8192 }
  0x19   :  { %p1968_p8 = scmp.ne.s32.totalorder %s2328_s4, %s1967_s15  ;;  %p1971_p9 = scmp.lt.u32.totalorder %s1967_s15, %s2328_s4 }
  0x1b   :  { %p1973_p10 = pnand %p1971_p9, %p1968_p8 }
  0x1d   :  { %1976 = shalt.err (!%p1973_p10)
}
  0x1e   :  { %s1977_s21 = scalar_lea.vmem %s2188_s22, 8192  ;;  %p1982_p12 = scmp.lt.s32.totalorder %s2188_s22, %s2188_s22 }
  0x1f   :  { %p1978_p11 = scmp.ne.s32.totalorder %s2188_s22, %s1977_s21  ;;  %p1983_p13 = scmp.lt.s32.totalorder %s1977_s21, %s1977_s21 }
  0x21   :  { %p1984_p0 = por %p1983_p13, %p1982_p12 }
  0x23   :  { %p1985_p1 = pnand %p1984_p0, %p1978_p11 }
  0x25   :  { %1988 = shalt.err (!%p1985_p1)
}
  0x26   :  { %s2111_s1 = smov 512   ;;  %s2112_s20 = smov 32  }
  0x27   :  { %69 = dma.hbm_to_vmem [thread:$0]  %s2328_s4, 8192, %s2188_s22, [#allocation11], %s2111_s1, %s2111_s1, %s2112_s20  }
  0x28   :  { %s2113_s25 = smov [#allocation4]   ;;  %s2114_s27 = smov [#allocation9]  }
  0x29   :  { %s30_s26 = sshll.u32 %s2113_s25, 4  ;;  %s49_s9 = sshll.u32 %s2114_s27, 4  ;;  %s31_s26 = int_to_ptr.vmem [resolvable:$true] %s30_s26  ;;  %s2219_s9 = int_to_ptr.vmem [resolvable:$true] %s49_s9 }
  0x2a   :  { %s1989_s30 = scalar_lea.hbm %s2324_s0, 128 }
  0x2b   :  { %p1990_p2 = scmp.ne.s32.totalorder %s2324_s0, %s1989_s30  ;;  %p1993_p3 = scmp.lt.u32.totalorder %s1989_s30, %s2324_s0 }
  0x2d   :  { %p1995_p4 = pnand %p1993_p3, %p1990_p2 }
  0x2f   :  { %1998 = shalt.err (!%p1995_p4)
}
  0x30   :  { %s1999_s4 = scalar_lea.vmem %s31_s26, 128  ;;  %p2004_p6 = scmp.lt.s32.totalorder %s31_s26, %s31_s26 }
  0x31   :  { %p2000_p5 = scmp.ne.s32.totalorder %s31_s26, %s1999_s4  ;;  %p2005_p7 = scmp.lt.s32.totalorder %s1999_s4, %s1999_s4 }
  0x33   :  { %p2006_p8 = por %p2005_p7, %p2004_p6 }
  0x35   :  { %p2007_p9 = pnand %p2006_p8, %p2000_p5 }
  0x37   :  { %2010 = shalt.err (!%p2007_p9)
}
  0x38   :  { %33 = dma.hbm_to_vmem [thread:$0]  %s2324_s0, 128, %s31_s26, [#allocation5]  }
  0x39   :  { %s2011_s19 = scalar_lea.hbm %s2326_s2, 256 }
  0x3a   :  { %p2012_p10 = scmp.ne.s32.totalorder %s2326_s2, %s2011_s19  ;;  %p2015_p11 = scmp.lt.u32.totalorder %s2011_s19, %s2326_s2 }
  0x3c   :  { %p2017_p12 = pnand %p2015_p11, %p2012_p10 }
  0x3e   :  { %2020 = shalt.err (!%p2017_p12)
}
  0x3f   :  { %s2021_s24 = scalar_lea.vmem %s2219_s9, 256  ;;  %p2026_p0 = scmp.lt.s32.totalorder %s2219_s9, %s2219_s9 }
  0x40   :  { %p2022_p13 = scmp.ne.s32.totalorder %s2219_s9, %s2021_s24  ;;  %p2027_p1 = scmp.lt.s32.totalorder %s2021_s24, %s2021_s24 }
  0x42   :  { %p2028_p2 = por %p2027_p1, %p2026_p0 }
  0x44   :  { %p2029_p3 = pnand %p2028_p2, %p2022_p13 }
  0x46   :  { %2032 = shalt.err (!%p2029_p3)
}
  0x47   :  { %s2115_s0 = smov 64   ;;  %s2116_s25 = smov 4  }
  0x48   :  { %55 = dma.hbm_to_vmem [thread:$0]  %s2326_s2, 256, %s2219_s9, [#allocation8], %s2115_s0, %s2115_s0, %s2116_s25  }
  0x49   :  { %s2117_s28 = smov [#allocation12]   ;;  %s2033_s13 = scalar_lea.hbm %s2330_s6, 8192 }
  0x4a   :  { %s77_s29 = sshll.u32 %s2117_s28, 4  ;;  %p2034_p4 = scmp.ne.s32.totalorder %s2330_s6, %s2033_s13  ;;  %s78_s29 = int_to_ptr.vmem [resolvable:$true] %s77_s29 }
  0x4b   :  { %p2037_p5 = scmp.lt.u32.totalorder %s2033_s13, %s2330_s6 }
  0x4d   :  { %p2039_p6 = pnand %p2037_p5, %p2034_p4 }
  0x4f   :  { %2042 = shalt.err (!%p2039_p6)
}
  0x50   :  { %s2043_s16 = scalar_lea.vmem %s78_s29, 8192  ;;  %p2048_p8 = scmp.lt.s32.totalorder %s78_s29, %s78_s29 }
  0x51   :  { %p2044_p7 = scmp.ne.s32.totalorder %s78_s29, %s2043_s16  ;;  %p2049_p9 = scmp.lt.s32.totalorder %s2043_s16, %s2043_s16 }
  0x53   :  { %p2050_p10 = por %p2049_p9, %p2048_p8 }
  0x55   :  { %p2051_p11 = pnand %p2050_p10, %p2044_p7 }
  0x57   :  { %2054 = shalt.err (!%p2051_p11)
}
  0x58   :  { %83 = dma.hbm_to_vmem [thread:$0]  %s2330_s6, 8192, %s78_s29, [#allocation11], %s2115_s0, %s2115_s0, %s2116_s25  }
  0x59   :  { %2099 = dma.done.wait [#allocation5], 128  }
  0x5a   :  { %2100 = vsyncadd [#allocation5], 4294967168 }
  0x5b   :  { %2101 = dma.done.wait [#allocation8], 1280  }
  0x5c   :  { %2102 = vsyncadd [#allocation8], 4294966016 }
  0x5d   :  { %2103 = dma.done.wait [#allocation11], 16384  }
  0x5e   :  { %2104 = vsyncadd [#allocation11], 4294950912  ;;  %v2118_v1 = vmov 0.0   ;;  %vm2119_vm0 = vmmov 0   ;;  %v1855_v2 = vld [vmem:[#allocation9] sm:$0xff]   ;;  %v1856_v3 = vld [vmem:[#allocation9 + $0x8] sm:$0xff]  }
  0x5f   :  { %1829 = vmatprep.subr.bf16.mxu0 %v2118_v1  ;;  %1833 = vmatprep.mubr.msk.bf16.mxu0 %vm2119_vm0, %v2118_v1  ;;  %v106_v4 = vld [vmem:[#allocation4] sm:$0xff]  ;;  %v179_v5 = vld [vmem:[#allocation10] sm:$0xff]  ;;  %vm131_vm1 = vcmask 261120  }
  0x60   :  { %1830 = vmatpush3.bf16.msra.mxu0 %v1855_v2  ;;  %v183_v6 = vld [vmem:[#allocation10 + $0x20] sm:$0xff]  ;;  %v180_v8 = vld [vmem:[#allocation10 + $0x8] sm:$0xff]  ;;  %v107_v16 = vpack.c.bf16 %v106_v4, %v106_v4 }
  0x61   :  { %1831 = vmatprep.subr.bf16.mxu0 %v2118_v1  ;;  %v1606_v7 = vcombine.high %v179_v5, %v183_v6  ;;  %v184_v9 = vld [vmem:[#allocation10 + $0x28] sm:$0xff]  ;;  %v1605_v10 = vcombine.low %v179_v5, %v183_v6  ;;  %v187_v11 = vld [vmem:[#allocation10 + $0x40] sm:$0xff]  ;;  %v181_v6 = vld [vmem:[#allocation10 + $0x10] sm:$0xff] }
  0x62   :  { %v1608_v12 = vcombine.high %v180_v8, %v184_v9  ;;  %v191_v13 = vld [vmem:[#allocation10 + $0x60] sm:$0xff]  ;;  %v188_v14 = vld [vmem:[#allocation10 + $0x48] sm:$0xff]  ;;  %v1607_v20 = vcombine.low %v180_v8, %v184_v9  ;;  %v182_v8 = vld [vmem:[#allocation10 + $0x18] sm:$0xff] }
  0x63   :  { %v192_v15 = vld [vmem:[#allocation10 + $0x68] sm:$0xff]  ;;  %605 = vmatprep.subr.bf16.mxu1 %v1606_v7  ;;  %v1614_v17 = vcombine.high %v187_v11, %v191_v13  ;;  %v195_v18 = vld [vmem:[#allocation10 + $0x80] sm:$0xff]  ;;  %v1613_v21 = vcombine.low %v187_v11, %v191_v13  ;;  %v185_v7 = vld [vmem:[#allocation10 + $0x30] sm:$0xff] }
  0x64   :  { %v199_v19 = vld [vmem:[#allocation10 + $0xa0] sm:$0xff]  ;;  %1832 = vmatpush3.bf16.msra.mxu0 %v1856_v3  ;;  %606 = vmatpush1.bf16.msra.mxu1 %v1605_v10  ;;  %v1616_v22 = vcombine.high %v188_v14, %v192_v15  ;;  %v196_v24 = vld [vmem:[#allocation10 + $0x88] sm:$0xff]  ;;  %v1615_v28 = vcombine.low %v188_v14, %v192_v15  ;;  %v1610_v9 = vcombine.high %v181_v6, %v185_v7  ;;  %v186_v10 = vld [vmem:[#allocation10 + $0x38] sm:$0xff]  ;;  %v2120_v14 = vmov 0  }
  0x65   :  { %646 = vmatprep.subr.bf16.mxu0 %v1608_v12  ;;  %607 = vmatprep.subr.bf16.mxu1 %v1614_v17  ;;  %v1622_v23 = vcombine.high %v195_v18, %v199_v19  ;;  %v200_v25 = vld [vmem:[#allocation10 + $0xa8] sm:$0xff]  ;;  %v203_v26 = vld [vmem:[#allocation10 + $0xc0] sm:$0xff]  ;;  %v1621_v29 = vcombine.low %v195_v18, %v199_v19  ;;  %v1609_v11 = vcombine.low %v181_v6, %v185_v7  ;;  %v237_v6 = vld [vmem:[#allocation10 + $0x1d0] sm:$0xff] }
  0x66   :  { %v207_v27 = vld [vmem:[#allocation10 + $0xe0] sm:$0xff]  ;;  %v204_v30 = vld [vmem:[#allocation10 + $0xc8] sm:$0xff]  ;;  %v1624_v31 = vcombine.high %v196_v24, %v200_v25  ;;  %v1623_v36 = vcombine.low %v196_v24, %v200_v25  ;;  %v1611_v12 = vcombine.low %v182_v8, %v186_v10  ;;  %v1612_v13 = vcombine.high %v182_v8, %v186_v10  ;;  %637 = vmatprep.mubr.bf16.mxu1 %v2120_v14  ;;  %v190_v24 = vld [vmem:[#allocation10 + $0x58] sm:$0xff] }
  0x67   :  { %1834 = vmatmul.mubr.msk.bf16.vlgmr.msra.gmra.mrb[0].mxu0 %vm131_vm1, %v107_v16  ;;  %v1630_v32 = vcombine.high %v203_v26, %v207_v27  ;;  %v208_v33 = vld [vmem:[#allocation10 + $0xe8] sm:$0xff]  ;;  %v211_v34 = vld [vmem:[#allocation10 + $0x100] sm:$0xff]  ;;  %v1629_v37 = vcombine.low %v203_v26, %v207_v27  ;;  %1853 = vset.pattern.permute.xlu1 %v2120_v14  ;;  %v194_v25 = vld [vmem:[#allocation10 + $0x78] sm:$0xff] }
  0x68   :  { %647 = vmatpush1.bf16.msra.mxu0 %v1607_v20  ;;  %608 = vmatpush1.bf16.msra.mxu1 %v1613_v21  ;;  %v215_v35 = vld [vmem:[#allocation10 + $0x120] sm:$0xff]  ;;  %v212_v38 = vld [vmem:[#allocation10 + $0x108] sm:$0xff]  ;;  %v1632_v42 = vcombine.high %v204_v30, %v208_v33  ;;  %v1631_v44 = vcombine.low %v204_v30, %v208_v33  ;;  %v189_v20 = vld [vmem:[#allocation10 + $0x50] sm:$0xff] }
  0x69   :  { %648 = vmatprep.subr.bf16.mxu0 %v1616_v22  ;;  %609 = vmatprep.subr.bf16.mxu1 %v1622_v23  ;;  %v216_v39 = vld [vmem:[#allocation10 + $0x128] sm:$0xff]  ;;  %v219_v40 = vld [vmem:[#allocation10 + $0x140] sm:$0xff]  ;;  %v1638_v43 = vcombine.high %v211_v34, %v215_v35  ;;  %v1637_v45 = vcombine.low %v211_v34, %v215_v35  ;;  %v193_v21 = vld [vmem:[#allocation10 + $0x70] sm:$0xff]  ;;  %v1619_v35 = vcombine.low %v190_v24, %v194_v25 }
  0x6a   :  { %v223_v41 = vld [vmem:[#allocation10 + $0x160] sm:$0xff]  ;;  %v220_v46 = vld [vmem:[#allocation10 + $0x148] sm:$0xff]  ;;  %v1640_v50 = vcombine.high %v212_v38, %v216_v39  ;;  %v1639_v52 = vcombine.low %v212_v38, %v216_v39  ;;  %678 = vmatprep.mubr.bf16.mxu0 %v2120_v14  ;;  %1854 = vset.pattern.permute.xlu0 %v2120_v14  ;;  %v197_v30 = vld [vmem:[#allocation10 + $0x90] sm:$0xff]  ;;  %v1617_v34 = vcombine.low %v189_v20, %v193_v21 }
  0x6b   :  { %v224_v47 = vld [vmem:[#allocation10 + $0x168] sm:$0xff]  ;;  %v227_v48 = vld [vmem:[#allocation10 + $0x180] sm:$0xff]  ;;  %v1646_v51 = vcombine.high %v219_v40, %v223_v41  ;;  %v1645_v53 = vcombine.low %v219_v40, %v223_v41  ;;  %v202_v33 = vld [vmem:[#allocation10 + $0xb8] sm:$0xff] }
  0x6c   :  { %649 = vmatpush1.bf16.msra.mxu0 %v1615_v28  ;;  %610 = vmatpush1.bf16.msra.mxu1 %v1621_v29  ;;  %v231_v49 = vld [vmem:[#allocation10 + $0x1a0] sm:$0xff]  ;;  %v228_v54 = vld [vmem:[#allocation10 + $0x188] sm:$0xff]  ;;  %v1648_v56 = vcombine.high %v220_v46, %v224_v47  ;;  %v1647_v58 = vcombine.low %v220_v46, %v224_v47  ;;  %v1618_v28 = vcombine.high %v189_v20, %v193_v21  ;;  %v205_v38 = vld [vmem:[#allocation10 + $0xd0] sm:$0xff] }
  0x6d   :  { %650 = vmatprep.subr.bf16.mxu0 %v1624_v31  ;;  %611 = vmatprep.subr.bf16.mxu1 %v1630_v32  ;;  %v232_v55 = vld [vmem:[#allocation10 + $0x1a8] sm:$0xff]  ;;  %v1654_v57 = vcombine.high %v227_v48, %v231_v49  ;;  %v1653_v61 = vcombine.low %v227_v48, %v231_v49  ;;  %v235_v62 = vld [vmem:[#allocation10 + $0x1c0] sm:$0xff]  ;;  %v1620_v29 = vcombine.high %v190_v24, %v194_v25  ;;  %v201_v31 = vld [vmem:[#allocation10 + $0xb0] sm:$0xff] }
  0x6e   :  { %v1656_v59 = vcombine.high %v228_v54, %v232_v55  ;;  %v1655_v60 = vcombine.low %v228_v54, %v232_v55  ;;  %v239_v63 = vld [vmem:[#allocation10 + $0x1e0] sm:$0xff]  ;;  %v236_v0 = vld [vmem:[#allocation10 + $0x1c8] sm:$0xff]  ;;  %v198_v32 = vld [vmem:[#allocation10 + $0x98] sm:$0xff] }
  0x6f   :  { %v1662_v1 = vcombine.high %v235_v62, %v239_v63  ;;  %v240_v2 = vld [vmem:[#allocation10 + $0x1e8] sm:$0xff]  ;;  %v1661_v5 = vcombine.low %v235_v62, %v239_v63  ;;  %v1601_v15 = vld [vmem:[%s2327_s3] ss:$0 sm:$0xff]  ;;  %v209_v39 = vld [vmem:[#allocation10 + $0xf0] sm:$0xff] }
  0x70   :  { %651 = vmatpush1.bf16.msra.mxu0 %v1623_v36  ;;  %612 = vmatpush1.bf16.msra.mxu1 %v1629_v37  ;;  %v1663_v3 = vcombine.low %v236_v0, %v240_v2  ;;  %v1664_v4 = vcombine.high %v236_v0, %v240_v2  ;;  %v1626_v36 = vcombine.high %v197_v30, %v201_v31  ;;  %v206_v40 = vld [vmem:[#allocation10 + $0xd8] sm:$0xff]  ;;  %v213_v46 = vld [vmem:[#allocation10 + $0x110] sm:$0xff]  ;;  %v1861_v20 = vld [vmem:[#allocation12 + $0x48] sm:$0xff]  }
  0x71   :  { %652 = vmatprep.subr.bf16.mxu0 %v1632_v42  ;;  %613 = vmatprep.subr.bf16.mxu1 %v1638_v43  ;;  %v1628_v37 = vcombine.high %v198_v32, %v202_v33  ;;  %v210_v41 = vld [vmem:[#allocation10 + $0xf8] sm:$0xff]  ;;  %v1625_v42 = vcombine.low %v197_v30, %v201_v31  ;;  %v1627_v43 = vcombine.low %v198_v32, %v202_v33  ;;  %v217_v47 = vld [vmem:[#allocation10 + $0x130] sm:$0xff]  ;;  %v1862_v21 = vld [vmem:[#allocation12 + $0xc8] sm:$0xff]  }
  0x72   :  { %v214_v48 = vld [vmem:[#allocation10 + $0x118] sm:$0xff]  ;;  %v221_v54 = vld [vmem:[#allocation10 + $0x150] sm:$0xff]  ;;  %v1873_v32 = vld [vmem:[#allocation12 + $0x60] sm:$0xff]  }
  0x73   :  { %v218_v49 = vld [vmem:[#allocation10 + $0x138] sm:$0xff]  ;;  %v225_v55 = vld [vmem:[#allocation10 + $0x170] sm:$0xff]  ;;  %v1874_v33 = vld [vmem:[#allocation12 + $0xe0] sm:$0xff]  }
  0x74   :  { %653 = vmatpush1.bf16.msra.mxu0 %v1631_v44  ;;  %614 = vmatpush1.bf16.msra.mxu1 %v1637_v45  ;;  %v1634_v44 = vcombine.high %v205_v38, %v209_v39  ;;  %v1636_v45 = vcombine.high %v206_v40, %v210_v41  ;;  %v229_v62 = vld [vmem:[#allocation10 + $0x190] sm:$0xff]  ;;  %v230_v0 = vld [vmem:[#allocation10 + $0x198] sm:$0xff]  ;;  %v1649_v2 = vcombine.low %v221_v54, %v225_v55 }
  0x75   :  { %654 = vmatprep.subr.bf16.mxu0 %v1640_v50  ;;  %615 = vmatprep.subr.bf16.mxu1 %v1646_v51  ;;  %v1633_v50 = vcombine.low %v205_v38, %v209_v39  ;;  %v1635_v51 = vcombine.low %v206_v40, %v210_v41  ;;  %v233_v63 = vld [vmem:[#allocation10 + $0x1b0] sm:$0xff]  ;;  %v238_v8 = vld [vmem:[#allocation10 + $0x1d8] sm:$0xff]  ;;  %v1879_v38 = vld [vmem:[#allocation12 + $0x28] sm:$0xff]  }
  0x76   :  { %v241_v7 = vld [vmem:[#allocation10 + $0x1f0] sm:$0xff]  ;;  %v1657_v10 = vcombine.low %v229_v62, %v233_v63  ;;  %v1870_v30 = vld [vmem:[#allocation12 + $0xd8] sm:$0xff]   ;;  %v1880_v39 = vld [vmem:[#allocation12 + $0xa8] sm:$0xff]  }
  0x77   :  { %v1865_v24 = vld [vmem:[#allocation12 + $0x50] sm:$0xff]   ;;  %v1871_v31 = vld [vmem:[#allocation12 + $0x18] sm:$0xff]  }
  0x78   :  { %655 = vmatpush1.bf16.msra.mxu0 %v1639_v52  ;;  %616 = vmatpush1.bf16.msra.mxu1 %v1645_v53  ;;  %v1642_v52 = vcombine.high %v213_v46, %v217_v47  ;;  %v1644_v53 = vcombine.high %v214_v48, %v218_v49  ;;  %v1866_v25 = vld [vmem:[#allocation12 + $0xd0] sm:$0xff]  }
  0x79   :  { %656 = vmatprep.subr.bf16.mxu0 %v1648_v56  ;;  %617 = vmatprep.subr.bf16.mxu1 %v1654_v57  ;;  %v222_v56 = vld [vmem:[#allocation10 + $0x158] sm:$0xff]  ;;  %v1881_v40 = vld [vmem:[#allocation12 + $0x70] sm:$0xff]  }
  0x7a   :  { %v226_v57 = vld [vmem:[#allocation10 + $0x178] sm:$0xff]  ;;  %v1882_v41 = vld [vmem:[#allocation12 + $0xf0] sm:$0xff]  }
  0x7c   :  { %657 = vmatpush1.bf16.msra.mxu0 %v1647_v58  ;;  %618 = vmatpush1.bf16.msra.mxu1 %v1653_v61  ;;  %v1641_v58 = vcombine.low %v213_v46, %v217_v47  ;;  %v1652_v61 = vcombine.high %v222_v56, %v226_v57  ;;  %v1887_v46 = vld [vmem:[#allocation12 + $0x38] sm:$0xff]  }
  0x7d   :  { %658 = vmatprep.subr.bf16.mxu0 %v1656_v59  ;;  %619 = vmatprep.subr.bf16.mxu1 %v1662_v1  ;;  %v1643_v59 = vcombine.low %v214_v48, %v218_v49  ;;  %v234_v1 = vld [vmem:[#allocation10 + $0x1b8] sm:$0xff]  ;;  %v1889_v48 = vld [vmem:[#allocation12 + $0x140] sm:$0xff]  }
  0x7e   :  { %v1888_v47 = vld [vmem:[#allocation12 + $0xb8] sm:$0xff]   ;;  %v1890_v49 = vld [vmem:[#allocation12 + $0x1c0] sm:$0xff]  }
  0x80   :  { %659 = vmatpush1.bf16.msra.mxu0 %v1655_v60  ;;  %620 = vmatpush1.bf16.msra.mxu1 %v1661_v5  ;;  %v1650_v60 = vcombine.high %v221_v54, %v225_v55  ;;  %v1660_v5 = vcombine.high %v230_v0, %v234_v1  ;;  %v2278_v54 = vld [vmem:[%s2329_s5] sm:$0xff] }
  0x81   :  { %660 = vmatprep.subr.bf16.mxu0 %v1664_v4  ;;  %687 = vmatprep.subr.bf16.mxu1 %v1610_v9  ;;  %v1658_v4 = vcombine.high %v229_v62, %v233_v63  ;;  %v242_v9 = vld [vmem:[#allocation10 + $0x1f8] sm:$0xff] }
  0x84   :  { %661 = vmatpush1.bf16.msra.mxu0 %v1663_v3  ;;  %v1651_v3 = vcombine.low %v222_v56, %v226_v57 }
  0x85   :  { %728 = vmatprep.subr.bf16.mxu0 %v1612_v13  ;;  %v1668_v13 = vcombine.high %v238_v8, %v242_v9 }
 0x13a   :  { %v169_v16 = vpop.f32.mrb[0].mxu0 }
 0x13b   :  { %v170_v17 = vadd.f32 %v1601_v15, %v169_v16  ;;  %v1835_v18 = vpop.f32.mrb[1].mxu0  ;;  %v1667_v15 = vcombine.low %v238_v8, %v242_v9  ;;  %v1857_v16 = vld [vmem:[#allocation12 + $0x40] sm:$0xff]  }
 0x13c   :  { %v172_v19 = vpop.f32.mrb[2].mxu0  ;;  %v1859_v18 = vld [vmem:[#allocation12] sm:$0xff]  }
 0x13d   :  { %vm175_vm2 = vcmp.gt.f32.partialorder %v170_v17, 0.0  ;;  %v176_v22 = vmul.f32 0.2, %v170_v17  ;;  %v1836_v23 = vpop.f32.mrb[3].mxu0  ;;  %v1860_v19 = vld [vmem:[#allocation12 + $0x80] sm:$0xff]  }
 0x13e   :  { %v1864_v23 = vld [vmem:[#allocation12 + $0x88] sm:$0xff]  }
 0x13f   :  { %v177_v26 = vsel %vm175_vm2, %v170_v17, %v176_v22  ;;  %v1858_v17 = vld [vmem:[#allocation12 + $0xc0] sm:$0xff]   ;;  %v1863_v22 = vld [vmem:[#allocation12 + $0x8] sm:$0xff]  }
 0x140   :  { %v2265_v27 = vpack.c.bf16 %v177_v26, %v177_v26  ;;  %v1867_v26 = vld [vmem:[#allocation12 + $0x10] sm:$0xff]  }
 0x142   :  { %638 = vmatmul.mubr.bf16.vlgmr.msra.gmra.mrb[0].mxu1 %v2265_v27  ;;  %679 = vmatmul.mubr.bf16.vlgmr.msra.gmra.mrb[4].mxu0 %v2265_v27 }
 0x143   :  { %688 = vmatpush1.bf16.msra.mxu1 %v1609_v11  ;;  %729 = vmatpush1.bf16.msra.mxu0 %v1611_v12  ;;  %v1659_v11 = vcombine.low %v230_v0, %v234_v1  ;;  %v1666_v12 = vcombine.high %v237_v6, %v241_v7 }
 0x144   :  { %689 = vmatprep.subr.bf16.mxu1 %v1618_v28  ;;  %730 = vmatprep.subr.bf16.mxu0 %v1620_v29  ;;  %v1868_v28 = vld [vmem:[#allocation12 + $0x90] sm:$0xff]   ;;  %v1869_v29 = vld [vmem:[#allocation12 + $0x58] sm:$0xff]  }
 0x145   :  { %719 = vmatprep.mubr.bf16.mxu1 %v2120_v14  ;;  %760 = vmatprep.mubr.bf16.mxu0 %v2120_v14  ;;  %v1665_v14 = vcombine.low %v237_v6, %v241_v7 }
 0x147   :  { %690 = vmatpush1.bf16.msra.mxu1 %v1617_v34  ;;  %731 = vmatpush1.bf16.msra.mxu0 %v1619_v35  ;;  %v1875_v34 = vld [vmem:[#allocation12 + $0x20] sm:$0xff]  }
 0x148   :  { %691 = vmatprep.subr.bf16.mxu1 %v1626_v36  ;;  %732 = vmatprep.subr.bf16.mxu0 %v1628_v37  ;;  %v1876_v35 = vld [vmem:[#allocation12 + $0xa0] sm:$0xff]   ;;  %v1877_v36 = vld [vmem:[#allocation12 + $0x68] sm:$0xff]  }
 0x149   :  { %v1878_v37 = vld [vmem:[#allocation12 + $0xe8] sm:$0xff]  }
 0x14b   :  { %692 = vmatpush1.bf16.msra.mxu1 %v1625_v42  ;;  %733 = vmatpush1.bf16.msra.mxu0 %v1627_v43  ;;  %v1883_v42 = vld [vmem:[#allocation12 + $0x30] sm:$0xff]  }
 0x14c   :  { %693 = vmatprep.subr.bf16.mxu1 %v1634_v44  ;;  %734 = vmatprep.subr.bf16.mxu0 %v1636_v45  ;;  %v1884_v43 = vld [vmem:[#allocation12 + $0xb0] sm:$0xff]   ;;  %v1885_v44 = vld [vmem:[#allocation12 + $0x78] sm:$0xff]  }
 0x14d   :  { %v1886_v45 = vld [vmem:[#allocation12 + $0xf8] sm:$0xff]  }
 0x14f   :  { %694 = vmatpush1.bf16.msra.mxu1 %v1633_v50  ;;  %735 = vmatpush1.bf16.msra.mxu0 %v1635_v51  ;;  %v245_v50 = vlaneseq }
 0x150   :  { %695 = vmatprep.subr.bf16.mxu1 %v1642_v52  ;;  %736 = vmatprep.subr.bf16.mxu0 %v1644_v53 }
 0x151   :  { %v2271_v51 = vshrl.u32 %v245_v50, 7 }
 0x153   :  { %696 = vmatpush1.bf16.msra.mxu1 %v1641_v58  ;;  %737 = vmatpush1.bf16.msra.mxu0 %v1643_v59  ;;  %v247_v52 = vsub.s32 0, %v2271_v51  ;;  %v255_v53 = vsub.s32 2, %v2271_v51  ;;  %v251_v55 = vsub.s32 1, %v2271_v51  ;;  %v259_v56 = vsub.s32 3, %v2271_v51 }
 0x154   :  { %697 = vmatprep.subr.bf16.mxu1 %v1650_v60  ;;  %738 = vmatprep.subr.bf16.mxu0 %v1652_v61 }
 0x155   :  { %v248_v57 = vrot.slane %v2278_v54, %v247_v52  ;;  %v256_v58 = vrot.slane %v2278_v54, %v255_v53  ;;  %v252_v59 = vrot.slane %v2278_v54, %v251_v55  ;;  %v260_v60 = vrot.slane %v2278_v54, %v259_v56  ;;  %v1908_v52 = vld [vmem:[#allocation12 + $0x1a0] sm:$0xff]   ;;  %v1909_v53 = vld [vmem:[#allocation12 + $0x168] sm:$0xff]  }
 0x157   :  { %698 = vmatpush1.bf16.msra.mxu1 %v1649_v2  ;;  %739 = vmatpush1.bf16.msra.mxu0 %v1651_v3 }
 0x158   :  { %699 = vmatprep.subr.bf16.mxu1 %v1658_v4  ;;  %740 = vmatprep.subr.bf16.mxu0 %v1660_v5 }
 0x15b   :  { %700 = vmatpush1.bf16.msra.mxu1 %v1657_v10  ;;  %741 = vmatpush1.bf16.msra.mxu0 %v1659_v11  ;;  %v794_v10 = vld [vmem:[#allocation7 + $0x8] sm:$0xff] }
 0x15c   :  { %701 = vmatprep.subr.bf16.mxu1 %v1666_v12  ;;  %742 = vmatprep.subr.bf16.mxu0 %v1668_v13  ;;  %v796_v12 = vld [vmem:[#allocation7 + $0x18] sm:$0xff]  ;;  %v793_v13 = vld [vmem:[#allocation7] sm:$0xff] }
 0x15f   :  { %702 = vmatpush1.bf16.msra.mxu1 %v1665_v14  ;;  %743 = vmatpush1.bf16.msra.mxu0 %v1667_v15  ;;  %v795_v15 = vld [vmem:[#allocation7 + $0x10] sm:$0xff] }
 0x160   :  { %1741 = vmatprep.subr.bf16.mxu1 %v1857_v16  ;;  %1763 = vmatprep.subr.bf16.mxu0 %v1858_v17 }
 0x162   :  { %720 = vmatmul.mubr.bf16.vlgmr.msra.gmra.mrb[4].mxu1 %v2265_v27  ;;  %761 = vmatmul.mubr.bf16.vlgmr.msra.gmra.mrb[8].mxu0 %v2265_v27  ;;  %v1872_v27 = vld [vmem:[#allocation12 + $0x98] sm:$0xff]  }
 0x163   :  { %1742 = vmatpush3.bf16.msra.mxu1 %v1859_v18  ;;  %1764 = vmatpush3.bf16.msra.mxu0 %v1860_v19  ;;  %v1891_v18 = vld [vmem:[#allocation12 + $0x100] sm:$0xff]  }
 0x164   :  { %1743 = vmatprep.subr.bf16.mxu1 %v1861_v20  ;;  %1765 = vmatprep.subr.bf16.mxu0 %v1862_v21  ;;  %v1892_v21 = vld [vmem:[#allocation12 + $0x180] sm:$0xff]  }
 0x167   :  { %1744 = vmatpush3.bf16.msra.mxu1 %v1863_v22  ;;  %1766 = vmatpush3.bf16.msra.mxu0 %v1864_v23  ;;  %v1893_v22 = vld [vmem:[#allocation12 + $0x148] sm:$0xff]  }
 0x168   :  { %1745 = vmatprep.subr.bf16.mxu1 %v1865_v24  ;;  %1767 = vmatprep.subr.bf16.mxu0 %v1866_v25  ;;  %v1894_v24 = vld [vmem:[#allocation12 + $0x1c8] sm:$0xff]  }
 0x169   :  { %v1895_v25 = vld [vmem:[#allocation12 + $0x108] sm:$0xff]  }
 0x16b   :  { %1746 = vmatpush3.bf16.msra.mxu1 %v1867_v26  ;;  %1768 = vmatpush3.bf16.msra.mxu0 %v1868_v28  ;;  %v1896_v26 = vld [vmem:[#allocation12 + $0x188] sm:$0xff]   ;;  %v1897_v28 = vld [vmem:[#allocation12 + $0x150] sm:$0xff]  }
 0x16c   :  { %1747 = vmatprep.subr.bf16.mxu1 %v1869_v29  ;;  %1769 = vmatprep.subr.bf16.mxu0 %v1870_v30  ;;  %v1898_v29 = vld [vmem:[#allocation12 + $0x1d0] sm:$0xff]  }
 0x16d   :  { %v1899_v30 = vld [vmem:[#allocation12 + $0x110] sm:$0xff]  }
 0x16f   :  { %1748 = vmatpush3.bf16.msra.mxu1 %v1871_v31  ;;  %1770 = vmatpush3.bf16.msra.mxu0 %v1872_v27  ;;  %v1900_v31 = vld [vmem:[#allocation12 + $0x190] sm:$0xff]   ;;  %v1901_v27 = vld [vmem:[#allocation12 + $0x158] sm:$0xff]  }
 0x170   :  { %1749 = vmatprep.subr.bf16.mxu1 %v1873_v32  ;;  %1771 = vmatprep.subr.bf16.mxu0 %v1874_v33  ;;  %v263_v32 = vsub.s32 4, %v2271_v51  ;;  %v271_v33 = vsub.s32 6, %v2271_v51 }
 0x173   :  { %1750 = vmatpush3.bf16.msra.mxu1 %v1875_v34  ;;  %1772 = vmatpush3.bf16.msra.mxu0 %v1876_v35  ;;  %v1902_v34 = vld [vmem:[#allocation12 + $0x1d8] sm:$0xff]   ;;  %v267_v35 = vsub.s32 5, %v2271_v51 }
 0x174   :  { %1751 = vmatprep.subr.bf16.mxu1 %v1877_v36  ;;  %1773 = vmatprep.subr.bf16.mxu0 %v1878_v37  ;;  %v275_v36 = vsub.s32 7, %v2271_v51  ;;  %v1903_v37 = vld [vmem:[#allocation12 + $0x118] sm:$0xff]  }
 0x177   :  { %1752 = vmatpush3.bf16.msra.mxu1 %v1879_v38  ;;  %1774 = vmatpush3.bf16.msra.mxu0 %v1880_v39  ;;  %v1904_v38 = vld [vmem:[#allocation12 + $0x198] sm:$0xff]   ;;  %v264_v39 = vrot.slane %v2278_v54, %v263_v32 }
 0x178   :  { %1753 = vmatprep.subr.bf16.mxu1 %v1881_v40  ;;  %1775 = vmatprep.subr.bf16.mxu0 %v1882_v41  ;;  %v272_v40 = vrot.slane %v2278_v54, %v271_v33  ;;  %v1905_v41 = vld [vmem:[#allocation12 + $0x160] sm:$0xff]  }
 0x17b   :  { %1754 = vmatpush3.bf16.msra.mxu1 %v1883_v42  ;;  %1776 = vmatpush3.bf16.msra.mxu0 %v1884_v43  ;;  %v268_v42 = vrot.slane %v2278_v54, %v267_v35  ;;  %v276_v43 = vrot.slane %v2278_v54, %v275_v36 }
 0x17c   :  { %1755 = vmatprep.subr.bf16.mxu1 %v1885_v44  ;;  %1777 = vmatprep.subr.bf16.mxu0 %v1886_v45  ;;  %v1906_v44 = vld [vmem:[#allocation12 + $0x1e0] sm:$0xff]  }
 0x17f   :  { %1756 = vmatpush3.bf16.msra.mxu1 %v1887_v46  ;;  %1778 = vmatpush3.bf16.msra.mxu0 %v1888_v47  ;;  %v1907_v47 = vld [vmem:[#allocation12 + $0x120] sm:$0xff]  }
 0x180   :  { %1785 = vmatprep.subr.bf16.mxu1 %v1889_v48  ;;  %1807 = vmatprep.subr.bf16.mxu0 %v1890_v49 }
 0x215   :  { %v639_v61 = vpop.f32.mrb[0].mxu1  ;;  %v680_v62 = vpop.f32.mrb[4].mxu0 }
 0x216   :  { %v640_v63 = vadd.f32 %v639_v61, %v248_v57  ;;  %v681_v0 = vadd.f32 %v680_v62, %v256_v58  ;;  %v641_v1 = vpop.f32.mrb[1].mxu1  ;;  %v682_v2 = vpop.f32.mrb[5].mxu0  ;;  %v1911_v61 = vld [vmem:[#allocation12 + $0x128] sm:$0xff]  }
 0x217   :  { %v642_v3 = vadd.f32 %v641_v1, %v252_v59  ;;  %v683_v4 = vadd.f32 %v682_v2, %v260_v60  ;;  %v643_v5 = vpop.f32.mrb[2].mxu1  ;;  %v684_v6 = vpop.f32.mrb[6].mxu0  ;;  %v1910_v59 = vld [vmem:[#allocation12 + $0x1e8] sm:$0xff]   ;;  %v1915_v1 = vld [vmem:[#allocation12 + $0x130] sm:$0xff]  }
 0x218   :  { %1921 = vtanh.f32 %v640_v63  ;;  %v644_v7 = vpop.f32.mrb[3].mxu1  ;;  %v685_v8 = vpop.f32.mrb[7].mxu0  ;;  %v1912_v62 = vld [vmem:[#allocation12 + $0x1a8] sm:$0xff]   ;;  %v1913_v63 = vld [vmem:[#allocation12 + $0x170] sm:$0xff]   ;;  %v1919_v5 = vld [vmem:[#allocation12 + $0x138] sm:$0xff]  }
 0x219   :  { %1923 = vtanh.f32 %v681_v0  ;;  %v1914_v0 = vld [vmem:[#allocation12 + $0x1f0] sm:$0xff]   ;;  %v1920_v7 = vld [vmem:[#allocation12 + $0x1b8] sm:$0xff]  }
 0x21a   :  { %1925 = vtanh.f32 %v642_v3  ;;  %v1916_v2 = vld [vmem:[#allocation12 + $0x1b0] sm:$0xff]   ;;  %v1917_v3 = vld [vmem:[#allocation12 + $0x178] sm:$0xff]  }
 0x21b   :  { %1927 = vtanh.f32 %v683_v4  ;;  %v1918_v4 = vld [vmem:[#allocation12 + $0x1f8] sm:$0xff]  }
 0x21c   :  { %v798_v8 = vld [vmem:[#allocation7 + $0x28] sm:$0xff] }
 0x222   :  { %v1922_v9 = vpop.eup %1921 }
 0x223   :  { %v1924_v11 = vpop.eup %1923  ;;  %777 = vst [vmem:[#allocation13] sm:$0xff] %v1922_v9  ;;  %v825_v20 = vpack.c.bf16 %v793_v13, %v1922_v9  ;;  %v799_v13 = vld [vmem:[#allocation7 + $0x30] sm:$0xff] }
 0x224   :  { %v1926_v14 = vpop.eup %1925  ;;  %779 = vst [vmem:[#allocation13 + $0x10] sm:$0xff] %v1924_v11  ;;  %v827_v23 = vpack.c.bf16 %v795_v15, %v1924_v11  ;;  %v797_v11 = vld [vmem:[#allocation7 + $0x20] sm:$0xff] }
 0x225   :  { %v1928_v16 = vpop.eup %1927  ;;  %778 = vst [vmem:[#allocation13 + $0x8] sm:$0xff] %v1926_v14  ;;  %v826_v17 = vpack.c.bf16 %v794_v10, %v1926_v14  ;;  %v800_v10 = vld [vmem:[#allocation7 + $0x38] sm:$0xff] }
 0x226   :  { %780 = vst [vmem:[#allocation13 + $0x18] sm:$0xff] %v1928_v16  ;;  %v828_v19 = vpack.c.bf16 %v796_v12, %v1928_v16 }
 0x227   :  { %1384 = vmatprep.mubr.bf16.mxu1 %v826_v17 }
 0x228   :  { %1425 = vmatprep.mubr.bf16.mxu0 %v828_v19  ;;  %1385 = vmatmul.mubr.bf16.vlgmr.msra.gmra.mrb[8].mxu1 %v825_v20 }
 0x229   :  { %1426 = vmatmul.mubr.bf16.vlgmr.msra.gmra.mrb[12].mxu0 %v827_v23  ;;  %1786 = vmatpush3.bf16.msra.mxu1 %v1891_v18 }
 0x22a   :  { %1808 = vmatpush3.bf16.msra.mxu0 %v1892_v21  ;;  %1787 = vmatprep.subr.bf16.mxu1 %v1893_v22  ;;  %v1669_v21 = vld [vmem:[%s2331_s7] ss:$0 sm:$0xff] }
 0x22b   :  { %1809 = vmatprep.subr.bf16.mxu0 %v1894_v24 }
 0x22d   :  { %1788 = vmatpush3.bf16.msra.mxu1 %v1895_v25 }
 0x22e   :  { %1810 = vmatpush3.bf16.msra.mxu0 %v1896_v26  ;;  %1789 = vmatprep.subr.bf16.mxu1 %v1897_v28 }
 0x22f   :  { %1811 = vmatprep.subr.bf16.mxu0 %v1898_v29 }
 0x231   :  { %1790 = vmatpush3.bf16.msra.mxu1 %v1899_v30 }
 0x232   :  { %1812 = vmatpush3.bf16.msra.mxu0 %v1900_v31  ;;  %1791 = vmatprep.subr.bf16.mxu1 %v1901_v27 }
 0x233   :  { %1813 = vmatprep.subr.bf16.mxu0 %v1902_v34 }
 0x235   :  { %1792 = vmatpush3.bf16.msra.mxu1 %v1903_v37  ;;  %v721_v45 = vpop.f32.mrb[4].mxu1  ;;  %v762_v46 = vpop.f32.mrb[8].mxu0 }
 0x236   :  { %1814 = vmatpush3.bf16.msra.mxu0 %v1904_v38  ;;  %v722_v48 = vadd.f32 %v721_v45, %v264_v39  ;;  %v763_v49 = vadd.f32 %v762_v46, %v272_v40  ;;  %v723_v50 = vpop.f32.mrb[5].mxu1  ;;  %v764_v51 = vpop.f32.mrb[9].mxu0  ;;  %1793 = vmatprep.subr.bf16.mxu1 %v1905_v41 }
 0x237   :  { %v724_v55 = vadd.f32 %v723_v50, %v268_v42  ;;  %v765_v56 = vadd.f32 %v764_v51, %v276_v43  ;;  %v725_v57 = vpop.f32.mrb[6].mxu1  ;;  %v766_v58 = vpop.f32.mrb[10].mxu0  ;;  %1815 = vmatprep.subr.bf16.mxu0 %v1906_v44 }
 0x238   :  { %1929 = vtanh.f32 %v722_v48  ;;  %v726_v54 = vpop.f32.mrb[7].mxu1  ;;  %v767_v60 = vpop.f32.mrb[11].mxu0 }
 0x239   :  { %1931 = vtanh.f32 %v763_v49  ;;  %1794 = vmatpush3.bf16.msra.mxu1 %v1907_v47  ;;  %v1735_v54 = vld [vmem:[#allocation3] ss:$0 sm:$0xff] }
 0x23a   :  { %1933 = vtanh.f32 %v724_v55  ;;  %1816 = vmatpush3.bf16.msra.mxu0 %v1908_v52  ;;  %1795 = vmatprep.subr.bf16.mxu1 %v1909_v53  ;;  %v1734_v53 = vld [vmem:[%s2332_s8] ss:$0 sm:$0xff]  ;;  %s2121_s8 = smov [#allocation13]  }
 0x23b   :  { %1935 = vtanh.f32 %v765_v56  ;;  %1817 = vmatprep.subr.bf16.mxu0 %v1910_v59  ;;  %s1574_s1 = sshll.u32 %s2121_s8, 4  ;;  %s1575_s1 = int_to_ptr.vmem [resolvable:$true] %s1574_s1 }
 0x23c   :  { %s2055_s20 = scalar_lea.vmem %s1575_s1, 1024  ;;  %p2060_p13 = scmp.lt.s32.totalorder %s1575_s1, %s1575_s1 }
 0x23d   :  { %1796 = vmatpush3.bf16.msra.mxu1 %v1911_v61  ;;  %p2056_p12 = scmp.ne.s32.totalorder %s1575_s1, %s2055_s20  ;;  %p2061_p0 = scmp.lt.s32.totalorder %s2055_s20, %s2055_s20 }
 0x23e   :  { %1818 = vmatpush3.bf16.msra.mxu0 %v1912_v62  ;;  %1797 = vmatprep.subr.bf16.mxu1 %v1913_v63 }
 0x23f   :  { %1819 = vmatprep.subr.bf16.mxu0 %v1914_v0  ;;  %p2062_p1 = por %p2061_p0, %p2060_p13 }
 0x241   :  { %1798 = vmatpush3.bf16.msra.mxu1 %v1915_v1  ;;  %p2063_p2 = pnand %p2062_p1, %p2056_p12 }
 0x242   :  { %v1930_v6 = vpop.eup %1929  ;;  %1820 = vmatpush3.bf16.msra.mxu0 %v1916_v2  ;;  %1799 = vmatprep.subr.bf16.mxu1 %v1917_v3 }
 0x243   :  { %v1932_v9 = vpop.eup %1931  ;;  %781 = vst [vmem:[#allocation13 + $0x20] sm:$0xff] %v1930_v6  ;;  %1821 = vmatprep.subr.bf16.mxu0 %v1918_v4  ;;  %v829_v17 = vpack.c.bf16 %v797_v11, %v1930_v6 }
 0x244   :  { %v1934_v12 = vpop.eup %1933  ;;  %783 = vst [vmem:[#allocation13 + $0x30] sm:$0xff] %v1932_v9  ;;  %v831_v18 = vpack.c.bf16 %v799_v13, %v1932_v9 }
 0x245   :  { %v1936_v14 = vpop.eup %1935  ;;  %782 = vst [vmem:[#allocation13 + $0x28] sm:$0xff] %v1934_v12  ;;  %1800 = vmatpush3.bf16.msra.mxu1 %v1919_v5  ;;  %v830_v15 = vpack.c.bf16 %v798_v8, %v1934_v12 }
 0x246   :  { %784 = vst [vmem:[#allocation13 + $0x38] sm:$0xff] %v1936_v14  ;;  %1822 = vmatpush3.bf16.msra.mxu0 %v1920_v7  ;;  %v832_v16 = vpack.c.bf16 %v800_v10, %v1936_v14 }
 0x247   :  { %1466 = vmatprep.mubr.bf16.mxu1 %v830_v15 }
 0x248   :  { %1507 = vmatprep.mubr.bf16.mxu0 %v832_v16  ;;  %1467 = vmatmul.mubr.bf16.vlgmr.msra.gmra.mrb[12].mxu1 %v829_v17 }
 0x249   :  { %1508 = vmatmul.mubr.bf16.vlgmr.msra.gmra.mrb[16].mxu0 %v831_v18 }
 0x2fb   :  { %v1757_v19 = vpop.f32.mrb[8].mxu1 }
 0x2fc   :  { %v1779_v20 = vpop.f32.mrb[12].mxu0  ;;  %v1758_v22 = vpop.f32.mrb[9].mxu1 }
 0x2fd   :  { %v1759_v23 = vadd.f32 %v1758_v22, %v1757_v19  ;;  %v1780_v24 = vpop.f32.mrb[13].mxu0  ;;  %v1760_v25 = vpop.f32.mrb[10].mxu1 }
 0x2fe   :  { %v1781_v26 = vadd.f32 %v1780_v24, %v1779_v20  ;;  %v1782_v28 = vpop.f32.mrb[14].mxu0  ;;  %v1761_v29 = vpop.f32.mrb[11].mxu1 }
 0x2ff   :  { %v1387_v30 = vadd.f32 %v1759_v23, %v1669_v21  ;;  %v1762_v31 = vadd.f32 %v1761_v29, %v1760_v25  ;;  %v1783_v27 = vpop.f32.mrb[15].mxu0 }
 0x300   :  { %v1784_v32 = vadd.f32 %v1783_v27, %v1782_v28 }
 0x301   :  { %v1428_v33 = vadd.f32 %v1781_v26, %v1387_v30  ;;  %v1390_v34 = vadd.f32 %v1762_v31, %v1669_v21 }
 0x303   :  { %v1431_v35 = vadd.f32 %v1784_v32, %v1390_v34 }
 0x31b   :  { %v1801_v36 = vpop.f32.mrb[12].mxu1 }
 0x31c   :  { %v1823_v37 = vpop.f32.mrb[16].mxu0  ;;  %v1802_v38 = vpop.f32.mrb[13].mxu1 }
 0x31d   :  { %v1803_v39 = vadd.f32 %v1802_v38, %v1801_v36  ;;  %v1824_v40 = vpop.f32.mrb[17].mxu0  ;;  %v1804_v41 = vpop.f32.mrb[14].mxu1 }
 0x31e   :  { %v1825_v42 = vadd.f32 %v1824_v40, %v1823_v37  ;;  %v1826_v43 = vpop.f32.mrb[18].mxu0  ;;  %v1805_v44 = vpop.f32.mrb[15].mxu1 }
 0x31f   :  { %v1469_v45 = vadd.f32 %v1803_v39, %v1428_v33  ;;  %v1806_v46 = vadd.f32 %v1805_v44, %v1804_v41  ;;  %v1827_v47 = vpop.f32.mrb[19].mxu0 }
 0x320   :  { %v1828_v48 = vadd.f32 %v1827_v47, %v1826_v43 }
 0x321   :  { %v1510_v49 = vadd.f32 %v1825_v42, %v1469_v45  ;;  %v1472_v50 = vadd.f32 %v1806_v46, %v1431_v35 }
 0x323   :  { %v1513_v51 = vadd.f32 %v1828_v48, %v1472_v50  ;;  %vm1516_vm3 = vcmp.gt.f32.partialorder %v1510_v49, 0.0  ;;  %v1518_v52 = vmul.f32 0.2, %v1510_v49 }
 0x325   :  { %v1520_v55 = vsel %vm1516_vm3, %v1510_v49, %v1518_v52  ;;  %vm1517_vm4 = vcmp.gt.f32.partialorder %v1513_v51, 0.0  ;;  %v1519_v56 = vmul.f32 0.2, %v1513_v51 }
 0x326   :  { %v1529_v57 = vmul.f32 %v1734_v53, %v1520_v55 }
 0x327   :  { %v1521_v58 = vsel %vm1517_vm4, %v1513_v51, %v1519_v56 }
 0x328   :  { %1531 = vadd.xlane.f32.xlu0 %v1529_v57  ;;  %v1530_v59 = vmul.f32 %v1734_v53, %v1521_v58 }
 0x32c   :  { %1533 = vadd.xlane.f32.xlu0 %v1530_v59 }
 0x3b5   :  { %v1532_v60 = vpop.xlane.xlu0 %1531 }
 0x3b6   :  { %v1542_v61 = vadd.f32 %v1735_v54, %v1532_v60 }
 0x3b8   :  { %v1736_v62 = vmul.f32 -1.442695, %v1542_v61 }
 0x3b9   :  { %v1534_v63 = vpop.xlane.xlu0 %1533 }
 0x3ba   :  { %1937 = vpow2.f32 %v1736_v62  ;;  %v1543_v0 = vadd.f32 %v1735_v54, %v1534_v63 }
 0x3bc   :  { %v1737_v1 = vmul.f32 -1.442695, %v1543_v0 }
 0x3be   :  { %1939 = vpow2.f32 %v1737_v1 }
 0x3c4   :  { %v1938_v2 = vpop.eup %1937 }
 0x3c5   :  { %v1550_v3 = vadd.f32 1.0, %v1938_v2 }
 0x3c7   :  { %1941 = vrcp.f32 %v1550_v3 }
 0x3c8   :  { %v1940_v4 = vpop.eup %1939 }
 0x3c9   :  { %v1551_v5 = vadd.f32 1.0, %v1940_v4 }
 0x3cb   :  { %1943 = vrcp.f32 %v1551_v5 }
 0x3d1   :  { %v1942_v6 = vpop.eup %1941 }
 0x3d2   :  { %1558 = vperm.xlu1 %1853, %v1942_v6  }
 0x3d5   :  { %v1944_v7 = vpop.eup %1943 }
 0x3d6   :  { %1563 = vperm.xlu1 %1853, %v1944_v7  }
 0x3d7   :  { %2066 = shalt.err (!%p2063_p2)
}
 0x3d8   :  { %s2067_s0 = scalar_lea.hbm %s2334_s10, 1024 }
 0x3d9   :  { %p2068_p3 = scmp.ne.s32.totalorder %s2334_s10, %s2067_s0  ;;  %p2071_p4 = scmp.lt.u32.totalorder %s2067_s0, %s2334_s10 }
 0x3db   :  { %p2073_p5 = pnand %p2071_p4, %p2068_p3 }
 0x3dd   :  { %2076 = shalt.err (!%p2073_p5)
}
 0x3de   :  { %1577 = dma.vmem_to_hbm [thread:$0]  %s1575_s1, 1024, %s2334_s10, [#allocation6]  }
 0x3df   :  { %s2122_s12 = smov [#allocation14]  }
 0x3e0   :  { %s1583_s13 = sshll.u32 %s2122_s12, 4  ;;  %s1584_s13 = int_to_ptr.vmem [resolvable:$true] %s1583_s13 }
 0x3e1   :  { %s2077_s14 = scalar_lea.vmem %s1584_s13, 256  ;;  %p2082_p7 = scmp.lt.s32.totalorder %s1584_s13, %s1584_s13 }
 0x3e2   :  { %p2078_p6 = scmp.ne.s32.totalorder %s1584_s13, %s2077_s14  ;;  %p2083_p8 = scmp.lt.s32.totalorder %s2077_s14, %s2077_s14 }
 0x3e4   :  { %p2084_p9 = por %p2083_p8, %p2082_p7 }
 0x3e6   :  { %p2085_p10 = pnand %p2084_p9, %p2078_p6 }
 0x451   :  { %v1559_v8 = vpop.permute.xlu1 %1558 }
 0x452   :  { %1566 = vst [vmem:[#allocation14] sm:$0xff] %v1559_v8 }
 0x455   :  { %v1564_v9 = vpop.permute.xlu1 %1563 }
 0x456   :  { %1567 = vst [vmem:[#allocation14 + $0x8] sm:$0xff] %v1564_v9 }
 0x457   :  { %2088 = shalt.err (!%p2085_p10)
}
 0x458   :  { %s2089_s22 = scalar_lea.hbm %s2335_s11, 256 }
 0x459   :  { %p2090_p11 = scmp.ne.s32.totalorder %s2335_s11, %s2089_s22  ;;  %p2093_p12 = scmp.lt.u32.totalorder %s2089_s22, %s2335_s11 }
 0x45b   :  { %p2095_p13 = pnand %p2093_p12, %p2090_p11 }
 0x45d   :  { %2098 = shalt.err (!%p2095_p13)
}
 0x45e   :  { %s2123_s6 = smov 128   ;;  %s2124_s17 = smov 8  }
 0x45f   :  { %1589 = dma.vmem_to_hbm [thread:$0]  %s1584_s13, 256, %s2335_s11, [#allocation15], %s2123_s6, %s2123_s6, %s2124_s17  }
 0x460   :  { %2105 = dma.done.wait [#allocation6], 1024  }
 0x461   :  { %2106 = vsyncadd [#allocation6], 4294966272 }
 0x462   :  { %2107 = dma.done.wait [#allocation15], 256  }
 0x463   :  { %2108 = vsyncadd [#allocation15], 4294967040 }
 0x464   :  { %1596 = vsyncpa [#allocation5], 1 }
 0x465   :  { %1597 = vsyncpa [#allocation8], 1 }
 0x466   :  { %1598 = vsyncpa [#allocation11], 1 }
 0x467   :  { %1599 = vsyncpa [#allocation6], 1 }
 0x468   :  { %1600 = vsyncpa [#allocation15], 1 }

</bundles_post_ra>
